<compile_context>
chip_gen: v7x
topology: tpu7x:2x2x1
jax: 0.10.0
libtpu: 0.0.40
codegen_flags: <defaults>
</compile_context>

<pallas_src>
import jax
import jax.numpy as jnp
from jax.experimental import pallas as pl
from jax.experimental.pallas import tpu as pltpu

HIDDEN = 64                 # GCN hidden width (GCNConv(input_dim, 64))
LANES = 128                 # lane-dense padding width
VALID_LANE = LANES - 1      # lane of x carrying the node-valid flag
VALUE_LANE = HIDDEN         # lanes 64..95 -> value head
NOTHING_LANE = HIDDEN + 32  # lanes 96..127 -> do_nothing head
PAD_SUBLANES = 16           # pad node count to a multiple of 16 (bf16 packing)


def _round_up(n, m):
    return -(-n // m) * m


# --------------------------------------------------------------------------
# Pallas kernel
# --------------------------------------------------------------------------
def _simple_net_max_kernel(a_ref, x_ref, w_ref, b_ref, out_ref):
    """Per-graph body.

    a:(1,Np,Np) bf16   x:(1,Np,128) bf16   w:(2,128,128) bf16 (resident)
    b:(2,128) f32 (resident)               out:(1,Np+8,128) f32
    """
    n_pad = a_ref.shape[1]
    a = a_ref[0]                     # (Np, Np)  bf16
    x = x_ref[0]                     # (Np, 128) bf16

    # conv_succ1: h = relu(A_hat @ (X @ W1) + b1)   (f32 accumulate / epilogue)
    xw = jnp.dot(x, w_ref[0], preferred_element_type=jnp.float32)
    h = jnp.dot(a, xw.astype(jnp.bfloat16), preferred_element_type=jnp.float32)
    h = jnp.maximum(h + b_ref[0:1, :], 0.0)

    # Zero rows of padded (non-existent) nodes so the max readout ignores them.
    # The valid flag lives in lane 127 of x; W1 row 127 is zero so it never
    # leaks into xw.  (ReLU >= 0, so zeroed pad rows can never win the max.)
    valid = x[:, VALID_LANE:VALID_LANE + 1].astype(jnp.float32)    # (Np, 1)
    h = h * valid

    # Global readout: max over nodes (torch.max(x, dim=0)[0]).
    x_max = jnp.max(h, axis=0, keepdims=True)                      # (1, 128)

    # Fused second matmul: rows 0..Np-1 = h (conv_probs pre-aggregation),
    # rows Np..Np+7 = x_max (heads).  W[1] lanes: 0..63 w2 | 64..95 wv | 96..127 wd.
    lhs = jnp.concatenate(
        [h, jnp.broadcast_to(x_max, (8, LANES))], axis=0).astype(jnp.bfloat16)
    res = jnp.dot(lhs, w_ref[1], preferred_element_type=jnp.float32)  # (Np+8,128)

    # conv_probs aggregation + bias; heads (row Np) just get the bias.
    logits = jnp.dot(a, res[:n_pad, :].astype(jnp.bfloat16),
                     preferred_element_type=jnp.float32) + b_ref[1:2, :]
    tail = res[n_pad:, :] + b_ref[1:2, :]            # row 0 = heads, rest filler

    # Single unmasked, lane-dense full-block store.
    out_ref[...] = jnp.concatenate([logits, tail], axis=0)[None]


def gcn_core(a_hat, x_padded, w_packed, b_packed):
    """Batched fused forward.  Weight/bias slabs use a constant index_map so
    they are fetched once and stay VMEM-resident for the whole batch."""
    bsz, n_pad, _ = a_hat.shape
    out_rows = n_pad + 8
    return pl.pallas_call(
        _simple_net_max_kernel,
        out_shape=jax.ShapeDtypeStruct((bsz, out_rows, LANES), jnp.float32),
        grid_spec=pltpu.PrefetchScalarGridSpec(
            num_scalar_prefetch=0,
            grid=(bsz,),
            in_specs=[
                pl.BlockSpec((1, n_pad, n_pad), lambda b: (b, 0, 0)),
                pl.BlockSpec((1, n_pad, LANES), lambda b: (b, 0, 0)),
                pl.BlockSpec((2, LANES, LANES), lambda b: (0, 0, 0)),  # resident
                pl.BlockSpec((2, LANES), lambda b: (0, 0)),            # resident
            ],
            out_specs=pl.BlockSpec((1, out_rows, LANES), lambda b: (b, 0, 0)),
        ),
        compiler_params=pltpu.CompilerParams(
            dimension_semantics=("parallel",)),
    )(a_hat, x_padded, w_packed, b_packed)


# --------------------------------------------------------------------------
# Parameter / graph packing
# --------------------------------------------------------------------------
def pack_params(params, input_dim, hidden=HIDDEN, lanes=LANES):
    """Consolidate the 8 weight/bias tensors into one bf16 weight slab and one
    f32 bias slab; the narrow (64x1) heads are lane-replicated / partitioned."""
    assert input_dim <= VALID_LANE and hidden == HIDDEN
    W = jnp.zeros((2, lanes, lanes), jnp.float32)
    W = W.at[0, :input_dim, :hidden].set(params["w1"])
    W = W.at[1, :hidden, :VALUE_LANE].set(
        jnp.broadcast_to(params["w2"], (hidden, VALUE_LANE)))
    W = W.at[1, :hidden, VALUE_LANE:NOTHING_LANE].set(
        jnp.broadcast_to(params["wv"], (hidden, NOTHING_LANE - VALUE_LANE)))
    W = W.at[1, :hidden, NOTHING_LANE:].set(
        jnp.broadcast_to(params["wd"], (hidden, lanes - NOTHING_LANE)))
    Bb = jnp.zeros((2, lanes), jnp.float32)
    Bb = Bb.at[0, :hidden].set(params["b1"].reshape(-1))
    Bb = Bb.at[1, :VALUE_LANE].set(params["b2"].reshape(()))
    Bb = Bb.at[1, VALUE_LANE:NOTHING_LANE].set(params["bv"].reshape(()))
    Bb = Bb.at[1, NOTHING_LANE:].set(params["bd"].reshape(()))
    return {"W": W.astype(jnp.bfloat16), "B": Bb}


def build_norm_adj(edge_index, num_nodes, n_pad):
    """GCN-normalized dense adjacency (flow='target_to_source', self loops),
    built with one-hot matmuls instead of a serial TPU scatter."""
    row, col = edge_index[0], edge_index[1]
    self_loop = jnp.arange(num_nodes, dtype=edge_index.dtype)
    row = jnp.concatenate([row, self_loop])
    col = jnp.concatenate([col, self_loop])
    oh_src = jax.nn.one_hot(row, n_pad, dtype=jnp.float32)      # (E+N, n_pad)
    oh_dst = jax.nn.one_hot(col, n_pad, dtype=jnp.float32)
    deg = jnp.sum(oh_src, axis=0)                               # out-degree + 1
    dinv = jnp.where(deg > 0, jax.lax.rsqrt(deg), 0.0)
    w = (oh_src @ dinv) * (oh_dst @ dinv)                       # per-edge norm
    return oh_src.T @ (w[:, None] * oh_dst)                     # A[src, dst]


def prepare_graph(x, edge_index, ready, n_pad):
    """Pad one graph to n_pad nodes and produce kernel-ready bf16 slabs."""
    n, f = x.shape
    a = build_norm_adj(edge_index, n, n_pad).astype(jnp.bfloat16)
    xp = jnp.zeros((n_pad, LANES), jnp.float32)
    xp = xp.at[:n, :f].set(x)
    xp = xp.at[:n, VALID_LANE].set(1.0)                        # node-valid flag
    rm = jnp.zeros((n_pad,), bool).at[:n].set(
        jnp.asarray(ready).reshape(-1).astype(bool))
    return a, xp.astype(jnp.bfloat16), rm


# --------------------------------------------------------------------------
# Forward wrappers
# --------------------------------------------------------------------------
@jax.jit
def simple_net_max_batched(packed, a_hat, x_padded, ready_mask):
    """Fixed-shape batched forward: (B, Np+1) masked probs and (B, 1) values."""
    n_pad = a_hat.shape[1]
    out = gcn_core(a_hat, x_padded, packed["W"], packed["B"])  # (B, Np+8, 128)
    node_logits = out[:, :n_pad, 0]
    v = out[:, n_pad, VALUE_LANE]
    nothing = out[:, n_pad, NOTHING_LANE]
    masked = jnp.where(ready_mask, node_logits, -jnp.inf)
    probs_full = jax.nn.softmax(
        jnp.concatenate([masked, nothing[:, None]], axis=1), axis=1)
    return probs_full, v[:, None]


def simple_net_max_forward(packed, x, edge_index, ready):
    """Module-equivalent single-graph API (probs compacted to num_ready + 1)."""
    n = x.shape[0]
    n_pad = _round_up(n, PAD_SUBLANES)
    a, xp, rm = prepare_graph(x, edge_index, ready, n_pad)
    probs_full, v = simple_net_max_batched(packed, a[None], xp[None], rm[None])
    probs_full = probs_full[0]
    ready_mask = jnp.asarray(ready).reshape(-1).astype(bool)
    # TODO(synk): the (num_ready + 1,) compaction has a data-dependent length,
    # so it stays eager; prefer the fixed-shape batched API in hot loops.
    probs = jnp.concatenate([probs_full[:n][ready_mask], probs_full[-1:]])
    return probs, v[0]


def reference_forward(params, x, edge_index, ready_mask):
    """Pure-JAX f32 reference with exactly the PyTorch module's math."""
    n = x.shape[0]
    a = build_norm_adj(edge_index, n, n)
    h = jnp.maximum(a @ (x @ params["w1"]) + params["b1"], 0.0)
    logits = (a @ (h @ params["w2"]) + params["b2"])[:, 0]
    x_max = jnp.max(h, axis=0)
    v = x_max @ params["wv"][:, 0] + params["bv"][0, 0]
    nothing = x_max @ params["wd"][:, 0] + params["bd"][0, 0]
    masked = jnp.where(ready_mask, logits, -jnp.inf)
    probs_full = jax.nn.softmax(jnp.concatenate([masked, nothing[None]]))
    return probs_full, v


# --------------------------------------------------------------------------
if __name__ == "__main__":
    B, N, F_IN, E = 4, 8, 16, 16
    N_PAD = _round_up(N, PAD_SUBLANES)

    keys = jax.random.split(jax.random.PRNGKey(0), 4 + 4 * B)
    params = {
        "w1": 0.1 * jax.random.normal(keys[0], (F_IN, HIDDEN), dtype=jnp.float32),
        "b1": jnp.full((1, HIDDEN), 0.01, jnp.float32),
        "w2": 0.1 * jax.random.normal(keys[1], (HIDDEN, 1), dtype=jnp.float32),
        "b2": jnp.full((1, 1), 0.02, jnp.float32),
        "wv": 0.1 * jax.random.normal(keys[2], (HIDDEN, 1), dtype=jnp.float32),
        "bv": jnp.full((1, 1), 0.03, jnp.float32),
        "wd": 0.1 * jax.random.normal(keys[3], (HIDDEN, 1), dtype=jnp.float32),
        "bd": jnp.full((1, 1), 0.04, jnp.float32),
    }
    packed = pack_params(params, F_IN)

    graphs, a_b, x_b, rm_b = [], [], [], []
    for g in range(B):
        kx, ks, kd, kr = keys[4 + 4 * g: 8 + 4 * g]
        x = jax.random.normal(kx, (N, F_IN), dtype=jnp.float32)
        src = jax.random.randint(ks, (E,), 0, N)
        dst = jax.random.randint(kd, (E,), 0, N)
        edge_index = jnp.stack([src, dst]).astype(jnp.int32)    # [2, E]
        ready = (jax.random.uniform(kr, (N, 1)) > 0.5).astype(jnp.int32)
        graphs.append((x, edge_index, ready))
        a, xp, rm = prepare_graph(x, edge_index, ready, N_PAD)
        a_b.append(a); x_b.append(xp); rm_b.append(rm)
    a_b, x_b, rm_b = jnp.stack(a_b), jnp.stack(x_b), jnp.stack(rm_b)

    probs_full, v = simple_net_max_batched(packed, a_b, x_b, rm_b)
    jax.block_until_ready((probs_full, v))
    assert probs_full.shape == (B, N_PAD + 1) and v.shape == (B, 1)

    # Per-graph correctness against the f32 reference (bf16 matmul tolerance).
    for g in range(B):
        x, edge_index, ready = graphs[g]
        rm = ready.reshape(-1).astype(bool)
        probs_ref, v_ref = reference_forward(params, x, edge_index, rm)
        probs_krn = jnp.concatenate([probs_full[g, :N], probs_full[g, -1:]])
        assert jnp.allclose(probs_krn, probs_ref, atol=2e-2, rtol=2e-2), g
        assert jnp.allclose(v[g, 0], v_ref, atol=2e-2, rtol=2e-2), g
        assert float(jnp.abs(probs_full[g, N:N_PAD]).max()) == 0.0  # pad nodes
        assert abs(float(probs_full[g].sum()) - 1.0) < 1e-4

    # Module-equivalent single-graph API (eager compaction to num_ready + 1).
    x0, ei0, ready0 = graphs[0]
    probs0, v0 = simple_net_max_forward(packed, x0, ei0, ready0)
    num_ready0 = int(ready0.sum())
    assert probs0.shape == (num_ready0 + 1,) and v0.shape == (1,)
    assert abs(float(probs0.sum()) - 1.0) < 1e-4

    print("KERNEL_OK")
</pallas_src>

<mosaic_0001>
module attributes {stable_mosaic.version = 11 : i64} {
  func.func @_simple_net_max_kernel(%arg0: i32, %arg1: memref<1x16x16xbf16, #tpu.memory_space<vmem>>, %arg2: memref<1x16x128xbf16, #tpu.memory_space<vmem>>, %arg3: memref<2x128x128xbf16, #tpu.memory_space<vmem>>, %arg4: memref<2x128xf32, #tpu.memory_space<vmem>>, %arg5: memref<1x24x128xf32, #tpu.memory_space<vmem>>) attributes {dimension_semantics = [#tpu.dimension_semantics<parallel>], iteration_bounds = array<i64: 4>, scalar_prefetch = 0 : i64, scratch_operands = 0 : i64, tpu.core_type = #tpu.core_type<tc>, window_params = [{transform_indices = @transform_0, window_bounds = array<i64: 1, 16, 16>}, {transform_indices = @transform_1, window_bounds = array<i64: 1, 16, 128>}, {pipeline_mode = #tpu.pipeline_mode<synchronous>, transform_indices = @transform_2, window_bounds = array<i64: 2, 128, 128>}, {pipeline_mode = #tpu.pipeline_mode<synchronous>, transform_indices = @transform_3, window_bounds = array<i64: 2, 128>}, {transform_indices = @transform_4, window_bounds = array<i64: 1, 24, 128>}]} {
    %c0 = arith.constant 0 : index
    %c0_0 = arith.constant 0 : index
    %c0_1 = arith.constant 0 : index
    %0 = vector.load %arg1[%c0, %c0_0, %c0_1] : memref<1x16x16xbf16, #tpu.memory_space<vmem>>, vector<1x16x16xbf16>
    %1 = vector.shape_cast %0 : vector<1x16x16xbf16> to vector<16x16xbf16>
    %c0_2 = arith.constant 0 : index
    %c0_3 = arith.constant 0 : index
    %c0_4 = arith.constant 0 : index
    %2 = vector.load %arg2[%c0_2, %c0_3, %c0_4] : memref<1x16x128xbf16, #tpu.memory_space<vmem>>, vector<1x16x128xbf16>
    %3 = vector.shape_cast %2 : vector<1x16x128xbf16> to vector<16x128xbf16>
    %c0_5 = arith.constant 0 : index
    %c0_6 = arith.constant 0 : index
    %c0_7 = arith.constant 0 : index
    %4 = vector.load %arg3[%c0_5, %c0_6, %c0_7] : memref<2x128x128xbf16, #tpu.memory_space<vmem>>, vector<1x128x128xbf16>
    %5 = vector.shape_cast %4 : vector<1x128x128xbf16> to vector<128x128xbf16>
    %cst = arith.constant dense<0.000000e+00> : vector<16x128xf32>
    %6 = tpu.matmul %3, %5, %cst {dimension_numbers = #tpu.dot_dimension_numbers<[1], [0], [0], [1], [0, 0, 1, 1], [], []>} : vector<16x128xbf16>, vector<128x128xbf16>, vector<16x128xf32> -> vector<16x128xf32>
    %7 = arith.truncf %6 : vector<16x128xf32> to vector<16x128xbf16>
    %cst_8 = arith.constant dense<0.000000e+00> : vector<16x128xf32>
    %8 = tpu.matmul %1, %7, %cst_8 {dimension_numbers = #tpu.dot_dimension_numbers<[1], [0], [0], [1], [0, 0, 1, 1], [], []>} : vector<16x16xbf16>, vector<16x128xbf16>, vector<16x128xf32> -> vector<16x128xf32>
    %c0_9 = arith.constant 0 : index
    %c0_10 = arith.constant 0 : index
    %9 = vector.load %arg4[%c0_9, %c0_10] : memref<2x128xf32, #tpu.memory_space<vmem>>, vector<1x128xf32>
    %10 = vector.broadcast %9 : vector<1x128xf32> to vector<16x128xf32>
    %11 = arith.addf %8, %10 : vector<16x128xf32>
    %cst_11 = arith.constant 0.000000e+00 : f32
    %12 = vector.broadcast %cst_11 : f32 to vector<16x128xf32>
    %13 = arith.maximumf %11, %12 : vector<16x128xf32>
    %14 = vector.extract_strided_slice %3 {offsets = [0, 127], sizes = [16, 1], strides = [1, 1]} : vector<16x128xbf16> to vector<16x1xbf16>
    %15 = arith.extf %14 : vector<16x1xbf16> to vector<16x1xf32>
    %16 = vector.broadcast %15 : vector<16x1xf32> to vector<16x128xf32>
    %17 = arith.mulf %13, %16 : vector<16x128xf32>
    %cst_12 = arith.constant dense<0xFF800000> : vector<128xf32>
    %18 = vector.multi_reduction <maximumf>, %17, %cst_12 [0] : vector<16x128xf32> to vector<128xf32>
    %19 = vector.shape_cast %18 : vector<128xf32> to vector<1x128xf32>
    %20 = vector.shape_cast %19 : vector<1x128xf32> to vector<1x128xf32>
    %21 = vector.broadcast %20 : vector<1x128xf32> to vector<8x128xf32>
    %22 = tpu.concatenate %17, %21 in 0 : vector<16x128xf32>, vector<8x128xf32> -> vector<24x128xf32>
    %23 = arith.truncf %22 : vector<24x128xf32> to vector<24x128xbf16>
    %c1 = arith.constant 1 : index
    %c0_13 = arith.constant 0 : index
    %c0_14 = arith.constant 0 : index
    %24 = vector.load %arg3[%c1, %c0_13, %c0_14] : memref<2x128x128xbf16, #tpu.memory_space<vmem>>, vector<1x128x128xbf16>
    %25 = vector.shape_cast %24 : vector<1x128x128xbf16> to vector<128x128xbf16>
    %cst_15 = arith.constant dense<0.000000e+00> : vector<24x128xf32>
    %26 = tpu.matmul %23, %25, %cst_15 {dimension_numbers = #tpu.dot_dimension_numbers<[1], [0], [0], [1], [0, 0, 1, 1], [], []>} : vector<24x128xbf16>, vector<128x128xbf16>, vector<24x128xf32> -> vector<24x128xf32>
    %27 = vector.extract_strided_slice %26 {offsets = [0, 0], sizes = [16, 128], strides = [1, 1]} : vector<24x128xf32> to vector<16x128xf32>
    %28 = arith.truncf %27 : vector<16x128xf32> to vector<16x128xbf16>
    %cst_16 = arith.constant dense<0.000000e+00> : vector<16x128xf32>
    %29 = tpu.matmul %1, %28, %cst_16 {dimension_numbers = #tpu.dot_dimension_numbers<[1], [0], [0], [1], [0, 0, 1, 1], [], []>} : vector<16x16xbf16>, vector<16x128xbf16>, vector<16x128xf32> -> vector<16x128xf32>
    %c1_17 = arith.constant 1 : index
    %c0_18 = arith.constant 0 : index
    %30 = vector.load %arg4[%c1_17, %c0_18] : memref<2x128xf32, #tpu.memory_space<vmem>>, vector<1x128xf32>
    %31 = vector.broadcast %30 : vector<1x128xf32> to vector<16x128xf32>
    %32 = arith.addf %29, %31 : vector<16x128xf32>
    %33 = vector.extract_strided_slice %26 {offsets = [16, 0], sizes = [8, 128], strides = [1, 1]} : vector<24x128xf32> to vector<8x128xf32>
    %c1_19 = arith.constant 1 : index
    %c0_20 = arith.constant 0 : index
    %34 = vector.load %arg4[%c1_19, %c0_20] : memref<2x128xf32, #tpu.memory_space<vmem>>, vector<1x128xf32>
    %35 = vector.broadcast %34 : vector<1x128xf32> to vector<8x128xf32>
    %36 = arith.addf %33, %35 : vector<8x128xf32>
    %37 = tpu.concatenate %32, %36 in 0 : vector<16x128xf32>, vector<8x128xf32> -> vector<24x128xf32>
    %38 = vector.shape_cast %37 : vector<24x128xf32> to vector<1x24x128xf32>
    %c0_21 = arith.constant 0 : index
    %c0_22 = arith.constant 0 : index
    %c0_23 = arith.constant 0 : index
    %39 = vector.load %arg5[%c0_21, %c0_22, %c0_23] : memref<1x24x128xf32, #tpu.memory_space<vmem>>, vector<1x24x128xf32>
    tpu.vector_store %arg5[%c0_21, %c0_22, %c0_23], %38 {strides = array<i32>} : memref<1x24x128xf32, #tpu.memory_space<vmem>>, vector<1x24x128xf32>,
    return
  }
  func.func @transform_0(%arg0: i32) -> (i32, i32, i32) {
    %c0_i32 = arith.constant 0 : i32
    %c0_i32_0 = arith.constant 0 : i32
    %c0_i32_1 = arith.constant 0 : i32
    return %arg0, %c0_i32, %c0_i32_0 : i32, i32, i32
  }
  func.func @transform_1(%arg0: i32) -> (i32, i32, i32) {
    %c0_i32 = arith.constant 0 : i32
    %c0_i32_0 = arith.constant 0 : i32
    %c0_i32_1 = arith.constant 0 : i32
    return %arg0, %c0_i32, %c0_i32_0 : i32, i32, i32
  }
  func.func @transform_2(%arg0: i32) -> (i32, i32, i32) {
    %c0_i32 = arith.constant 0 : i32
    %c0_i32_0 = arith.constant 0 : i32
    %c0_i32_1 = arith.constant 0 : i32
    %c0_i32_2 = arith.constant 0 : i32
    return %c0_i32, %c0_i32_0, %c0_i32_1 : i32, i32, i32
  }
  func.func @transform_3(%arg0: i32) -> (i32, i32) {
    %c0_i32 = arith.constant 0 : i32
    %c0_i32_0 = arith.constant 0 : i32
    %c0_i32_1 = arith.constant 0 : i32
    return %c0_i32, %c0_i32_0 : i32, i32
  }
  func.func @transform_4(%arg0: i32) -> (i32, i32, i32) {
    %c0_i32 = arith.constant 0 : i32
    %c0_i32_0 = arith.constant 0 : i32
    %c0_i32_1 = arith.constant 0 : i32
    return %arg0, %c0_i32, %c0_i32_0 : i32, i32, i32
  }
}

</mosaic_0001>

<bundles_post_ra>
// kernel: simple_net_max_batched.1
= control target key start
LH: loop header
LB: loop body
LE: loop exit
PB: predicated region body
PF: predicated region fallthrough
CT: control target
= control target key end

     0   :  { %9 = vsyncpa [#allocation3], 0  ;;  %s1415_s0 = inlined_call_operand.hbm [shape: bf16[4,16,16], index: 0, kind: input, shape index: {}]   ;;  %s1416_s1 = inlined_call_operand.hbm [shape: bf16[4,16,128], index: 1, kind: input, shape index: {}]   ;;  %s1417_s2 = inlined_call_operand.hbm [shape: bf16[2,128,128], index: 2, kind: input, shape index: {}]   ;;  %s1418_s3 = inlined_call_operand.hbm [shape: f32[2,128], index: 3, kind: input, shape index: {}]   ;;  %s1419_s4 = inlined_call_operand.vmem [shape: f32[4,24,128], index: 4, kind: output, shape index: {}]  }
   0x1   :  { %11 = vsyncpa [#allocation3 + $0x1], 0 }
   0x2   :  { %12 = vsyncpa [#allocation5], 0 }
   0x3   :  { %14 = vsyncpa [#allocation5 + $0x1], 0 }
   0x4   :  { %15 = vsyncpa [#allocation8], 0  ;;  %s1167_s15 = smov 0   ;;  %s1169_s16 = smov 0  }
   0x5   :  { %s1171_s17 = smov 0   ;;  %s1173_s18 = smov 0  }
   0x6 LB: > { %s1186_s19 = sadd.s32 4294967295, %s1131_s18   ;;  %p41_p0 = scmp.ne.s32.totalorder %s1123_s16, %s1119_s15  ;;  %s1131_s18 = sphi %s1173_s18, %s1436_s18   ;;  %s1127_s17 = sphi %s1171_s17, %s1435_s17   ;;  %s1123_s16 = sphi %s1169_s16, %s1434_s16   ;;  %s1119_s15 = sphi %s1167_s15, %s1433_s15  }
   0x7   : > { %p1420_p1 = scmp.eq.s32.totalorder %s1186_s19, 0  ;;  %p756_p2 = scmp.ge.s32.totalorder %s1131_s18, 1 }
   0x8   : > { %p146_p3 = scmp.lt.s32.totalorder %s1131_s18, 5  ;;  %s1133_s22 = smov [#allocation6]  }
   0x9   : > { %p1194_p4 = por %p1420_p1, %p41_p0  ;;  %s158_s23 = sshll.u32 %s1133_s22, 4  ;;  %s159_s23 = int_to_ptr.vmem [resolvable:$true] %s158_s23 }
   0xa   : > { %p1198_p5 = pnand %p756_p2, %p146_p3  ;;  %s1134_s25 = smov [#allocation7]  }
   0xb   : > { %s1423_s20 = scalar_select %p1194_p4, 1, 0 }
   0xc   : > { %s1424_s21 = scalar_select %p1198_p5, 1, 0 }
   0xd   : > { %p886_p6 = pneg %p1198_p5  ;;  %s172_s26 = sshll.u32 %s1134_s25, 4  ;;  %s1210_s26 = int_to_ptr.vmem [resolvable:$true] %s172_s26 }
   0xe   : > { %s969_s29 = scalar_lea.hbm %s1417_s2, 2048 }
   0xf   : > { %p1206_p7 = pnand %p886_p6, %p1420_p1  ;;  %p970_p8 = scmp.ne.s32.totalorder %s1417_s2, %s969_s29 }
  0x10   : > { %p976_p12 = scmp.lt.u32.totalorder %s969_s29, %s1417_s2 }
  0x11   : > { %p971_p9 = pneg %p1206_p7 }
  0x13   : > { %p972_p10 = pnand %p971_p9, %p970_p8 }
  0x15   : > { %p973_p11 = pneg %p972_p10 }
  0x17   : > { %p978_p13 = pnand %p976_p12, %p973_p11 }
  0x19   : > { %981 = shalt.err (!%p978_p13)
}
  0x1a   : > { %s982_s8 = scalar_lea.vmem %s159_s23, 2048  ;;  %p990_p6 = scmp.lt.s32.totalorder %s159_s23, %s159_s23 }
  0x1b   : > { %p983_p0 = scmp.ne.s32.totalorder %s159_s23, %s982_s8  ;;  %p991_p1 = scmp.lt.s32.totalorder %s982_s8, %s982_s8 }
  0x1d   : > { %p985_p2 = pnand %p983_p0, %p971_p9  ;;  %p992_p4 = por %p991_p1, %p990_p6 }
  0x1f   : > { %p986_p3 = pneg %p985_p2 }
  0x21   : > { %p993_p5 = pnand %p992_p4, %p986_p3 }
  0x23   : > { %996 = shalt.err (!%p993_p5)
}
  0x24   : > { %s1135_s9 = smov 64   ;;  %s1136_s10 = smov 4  }
  0x25   : > { %889 = dma.hbm_to_vmem [thread:$0]  (!%p1206_p7), %s1417_s2, 2048, %s159_s23, [#allocation5], %s1135_s9, %s1135_s9, %s1136_s10  }
  0x26   : > { %s997_s15 = scalar_lea.hbm %s1418_s3, 32 }
  0x27   : > { %p998_p1 = scmp.ne.s32.totalorder %s1418_s3, %s997_s15  ;;  %p1004_p8 = scmp.lt.u32.totalorder %s997_s15, %s1418_s3 }
  0x29   : > { %p1000_p4 = pnand %p998_p1, %p971_p9 }
  0x2b   : > { %p1001_p5 = pneg %p1000_p4 }
  0x2d   : > { %p1006_p10 = pnand %p1004_p8, %p1001_p5 }
  0x2f   : > { %1009 = shalt.err (!%p1006_p10)
}
  0x30   : > { %s1010_s23 = scalar_lea.vmem %s1210_s26, 32  ;;  %p1018_p0 = scmp.lt.s32.totalorder %s1210_s26, %s1210_s26 }
  0x31   : > { %p1011_p11 = scmp.ne.s32.totalorder %s1210_s26, %s1010_s23  ;;  %p1019_p2 = scmp.lt.s32.totalorder %s1010_s23, %s1010_s23 }
  0x33   : > { %p1013_p12 = pnand %p1011_p11, %p971_p9  ;;  %p1020_p3 = por %p1019_p2, %p1018_p0 }
  0x35   : > { %p1014_p13 = pneg %p1013_p12 }
  0x37   : > { %p1021_p6 = pnand %p1020_p3, %p1014_p13 }
  0x39   : > { %1024 = shalt.err (!%p1021_p6)
}
  0x3a   : > { %892 = dma.hbm_to_vmem [thread:$0]  (!%p1206_p7), %s1418_s3, 32, %s1210_s26, [#allocation8]  }
  0x3b   : > { %s1263_s5 = sadd.s32 1, %s1131_s18   ;;  %s28_s6 = sadd.s32 1, %s1127_s17 }
  0x3c   : > { %s25_s24 = ssub.s32 %s1131_s18, %s1263_s5  ;;  %p35_p9 = scmp.ne.s32.totalorder %s1127_s17, %s1123_s16 }
  0x3d   : > { %p26_p1 = scmp.eq.s32.totalorder %s25_s24, 0  ;;  %p36_p4 = scmp.eq.s32.totalorder %s1131_s18, 0 }
  0x3e   : > { %p902_p5 = scmp.lt.s32.totalorder %s1131_s18, 4  ;;  %s183_s7 = sand.u32 1, %s1127_s17  }
  0x3f   : > { %s1274_s8 = scalar_select %p26_p1, %s1127_s17, %s28_s6  }
  0x40   : > { %p37_p8 = por %p36_p4, %p35_p9  ;;  %s1276_s11 = sshll.u32 %s183_s7, 3 }
  0x41   : > { %s796_s12 = sshll.u32 %s1131_s18, 7  ;;  %s187_s15 = scalar_lea.vmem [#allocation2], %s1276_s11 }
  0x42   : > { %s1282_s26 = scalar_lea.hbm %s1415_s0, %s796_s12  ;;  %s194_s22 = sshll.u32 %s187_s15, 4  ;;  %s1289_s22 = int_to_ptr.vmem [resolvable:$true] %s194_s22 }
  0x43   : > { %p1285_p7 = pnand %p902_p5, %p37_p8  ;;  %s1294_s23 = scalar_lea.hbm %s1416_s1, %s796_s12 }
  0x44   : > { %s1296_s29 = scalar_lea.sflag [#allocation3], %s183_s7  ;;  %s1025_s30 = scalar_lea.hbm %s1282_s26, 128 }
  0x45   : > { %p1026_p10 = scmp.ne.s32.totalorder %s1282_s26, %s1025_s30  ;;  %p1027_p11 = pneg %p1285_p7 }
  0x46   : > { %s1030_s13 = scalar_lea.hbm %s1415_s0, 512  ;;  %p1031_p0 = scmp.lt.u32.totalorder %s1282_s26, %s1415_s0 }
  0x47   : > { %p1028_p12 = pnand %p1027_p11, %p1026_p10  ;;  %p1032_p2 = scmp.lt.u32.totalorder %s1030_s13, %s1025_s30 }
  0x48   : > { %p1034_p6 = scmp.lt.u32.totalorder %s1025_s30, %s1282_s26 }
  0x49   : > { %p1029_p13 = pneg %p1028_p12  ;;  %p1033_p3 = por %p1032_p2, %p1031_p0 }
  0x4b   : > { %p1035_p9 = por %p1034_p6, %p1033_p3 }
  0x4d   : > { %p1036_p1 = pnand %p1035_p9, %p1029_p13 }
  0x4f   : > { %1039 = shalt.err (!%p1036_p1)
}
  0x50   : > { %s1040_s7 = scalar_lea.vmem %s1289_s22, 128  ;;  %s1137_s12 = smov [#allocation2]  }
  0x51   : > { %p1041_p4 = scmp.ne.s32.totalorder %s1289_s22, %s1040_s7  ;;  %s1045_s27 = sshll.u32 %s1137_s12, 4  ;;  %s1046_s27 = int_to_ptr.vmem [resolvable:$false] %s1045_s27 }
  0x52   : > { %s1047_s28 = scalar_lea.vmem %s1046_s27, 256  ;;  %p1048_p10 = scmp.lt.s32.totalorder %s1289_s22, %s1046_s27 }
  0x53   : > { %p1043_p5 = pnand %p1041_p4, %p1027_p11  ;;  %p1049_p12 = scmp.lt.s32.totalorder %s1047_s28, %s1040_s7 }
  0x55   : > { %p1044_p8 = pneg %p1043_p5  ;;  %p1050_p0 = por %p1049_p12, %p1048_p10 }
  0x57   : > { %p1051_p2 = pnand %p1050_p0, %p1044_p8 }
  0x59   : > { %1054 = shalt.err (!%p1051_p2)
}
  0x5a   : > { %896 = dma.hbm_to_vmem [thread:$0]  (!%p1285_p7), %s1282_s26, 128, %s1289_s22, %s1296_s29, %s1135_s9, %s1135_s9, %s1136_s10  }
  0x5b   : > { %s208_s30 = scalar_lea.vmem [#allocation4], %s1276_s11  ;;  %s204_s24 = sand.u32 1, %s1131_s18  }
  0x5c   : > { %s215_s6 = sshll.u32 %s208_s30, 4  ;;  %s1331_s13 = scalar_lea.sflag [#allocation5], %s204_s24  ;;  %s1329_s6 = int_to_ptr.vmem [resolvable:$true] %s215_s6 }
  0x5d   : > { %s1055_s14 = scalar_lea.hbm %s1294_s23, 128  ;;  %s1060_s12 = scalar_lea.hbm %s1416_s1, 512 }
  0x5e   : > { %p1056_p13 = scmp.ne.s32.totalorder %s1294_s23, %s1055_s14  ;;  %p1061_p9 = scmp.lt.u32.totalorder %s1294_s23, %s1416_s1 }
  0x5f   : > { %p1062_p1 = scmp.lt.u32.totalorder %s1060_s12, %s1055_s14  ;;  %p1064_p5 = scmp.lt.u32.totalorder %s1055_s14, %s1294_s23 }
  0x60   : > { %p1058_p3 = pnand %p1056_p13, %p1027_p11 }
  0x61   : > { %p1063_p4 = por %p1062_p1, %p1061_p9 }
  0x62   : > { %p1059_p6 = pneg %p1058_p3 }
  0x63   : > { %p1065_p8 = por %p1064_p5, %p1063_p4 }
  0x65   : > { %p1066_p10 = pnand %p1065_p8, %p1059_p6 }
  0x67   : > { %1069 = shalt.err (!%p1066_p10)
}
  0x68   : > { %s1070_s18 = scalar_lea.vmem %s1329_s6, 128  ;;  %s1138_s11 = smov [#allocation4]  }
  0x69   : > { %p1071_p12 = scmp.ne.s32.totalorder %s1329_s6, %s1070_s18  ;;  %s1075_s26 = sshll.u32 %s1138_s11, 4  ;;  %s1076_s26 = int_to_ptr.vmem [resolvable:$false] %s1075_s26 }
  0x6a   : > { %s1077_s22 = scalar_lea.vmem %s1076_s26, 256  ;;  %p1078_p13 = scmp.lt.s32.totalorder %s1329_s6, %s1076_s26 }
  0x6b   : > { %p1073_p0 = pnand %p1071_p12, %p1027_p11  ;;  %p1079_p3 = scmp.lt.s32.totalorder %s1077_s22, %s1070_s18 }
  0x6d   : > { %p1074_p2 = pneg %p1073_p0  ;;  %p1080_p9 = por %p1079_p3, %p1078_p13 }
  0x6f   : > { %p1081_p1 = pnand %p1080_p9, %p1074_p2 }
  0x71   : > { %1084 = shalt.err (!%p1081_p1)
}
  0x72   : > { %899 = dma.hbm_to_vmem [thread:$0]  (!%p1285_p7), %s1294_s23, 128, %s1329_s6, %s1331_s13, %s1135_s9, %s1135_s9, %s1136_s10  }
  0x73   : > { %p1427_p11 = scmp.ne.s32.totalorder %s1424_s21, 0 }
  0x74   : > { %s229_s29 = sand.u32 (!%p1427_p11), 1, %s1123_s16   ;;  %p1428_p6 = scmp.ne.s32.totalorder (!%p1427_p11), %s1423_s20, 0 }
  0x75   : > { %227 = sbr.rel (%p1427_p11) target bundleno = 1061 (0x425), region = 36  ;;  %s1363_s30 = sshll.u32 (!%p1427_p11), %s229_s29, 3 }
  0x76   : > { %s230_s24 = scalar_lea.sflag (!%p1427_p11), [#allocation3], %s229_s29  ;;  %s233_s14 = scalar_lea.vmem (!%p1427_p11), [#allocation2], %s1363_s30 }
  0x7c   : > { %1102 = dma.done.wait (%p1428_p6), %s230_s24, 128  }
  0x7d   : > { %1104 = vsyncadd (%p1428_p6), %s230_s24, 4294967168  ;;  %s238_s9 = sand.u32 1, %s1186_s19   ;;  %s242_s21 = scalar_lea.vmem [#allocation4], %s1363_s30 }
  0x7e   : > { %s239_s10 = scalar_lea.sflag [#allocation5], %s238_s9 }
  0x7f   : > { %1106 = dma.done.wait (%p1428_p6), %s239_s10, 128  }
  0x80   : > { %1108 = vsyncadd (%p1428_p6), %s239_s10, 4294967168  ;;  %p1429_p7 = scmp.eq.s32.totalorder %s1186_s19, 0 }
  0x82   : > { %1110 = dma.done.wait (%p1429_p7), [#allocation5], 2048   ;;  %p1430_p4 = pmov %p1429_p7 }
  0x84   : > { %1112 = vsyncadd (%p1430_p4), [#allocation5], 4294965248  ;;  %p1431_p5 = pmov %p1430_p4 }
  0x85   : > { %p1432_p8 = pmov %p1430_p4 }
  0x86   : > { %1114 = dma.done.wait (%p1431_p5), [#allocation8], 32  }
  0x87   : > { %1116 = vsyncadd (%p1432_p8), [#allocation8], 4294967264  ;;  %v1139_v0 = vmov 0.0   ;;  %vm1140_vm0 = vmmov 0   ;;  %v950_v1 = vld [vmem:[#allocation6] sm:$0xff]   ;;  %v951_v2 = vld [vmem:[#allocation6 + $0x8] sm:$0xff]  }
  0x88   : > { %821 = vmatprep.subr.bf16.mxu0 %v1139_v0  ;;  %837 = vmatprep.mubr.msk.bf16.mxu0 %vm1140_vm0, %v1139_v0  ;;  %v952_v3 = vld [vmem:[#allocation6 + $0x10] sm:$0xff]   ;;  %v953_v4 = vld [vmem:[#allocation6 + $0x18] sm:$0xff]   ;;  %v954_v5 = vld [vmem:[#allocation6 + $0x20] sm:$0xff]   ;;  %v1141_v12 = vmov 127   ;;  %vm412_vm1 = vcmask 130048   ;;  %p280_p10 = scmp.lt.s32.totalorder %s1186_s19, 3 }
  0x89   : > { %841 = vmatprep.subr.bf16.mxu1 %v1139_v0  ;;  %843 = vmatprep.mubr.msk.bf16.mxu1 %vm1140_vm0, %v1139_v0  ;;  %v955_v6 = vld [vmem:[#allocation6 + $0x28] sm:$0xff]   ;;  %v956_v7 = vld [vmem:[#allocation6 + $0x30] sm:$0xff]   ;;  %v957_v8 = vld [vmem:[#allocation6 + $0x38] sm:$0xff]  }
  0x8a   : > { %822 = vmatpush3.bf16.msra.mxu0 %v950_v1  ;;  %v288_v9 = vld [vmem:[%s242_s21] sm:$0xff]   ;;  %944 = vset.pattern.permute.xlu0 %v1141_v12  ;;  %v960_v17 = vld [vmem:[#allocation6 + $0x40] sm:$0xff]   ;;  %v961_v21 = vld [vmem:[#allocation6 + $0x48] sm:$0xff]   ;;  %s1438_s19 = smov (!%p280_p10, %s1186_s19), 3 }
  0x8b   : > { %823 = vmatprep.subr.bf16.mxu0 %v1139_v0  ;;  %v459_v10 = vunpack.c.l.bf16 %v288_v9  ;;  %v460_v11 = vunpack.c.h.bf16 %v288_v9  ;;  %v1391_v20 = vld [vmem:[%s233_s14] sm:$0xff]   ;;  %v962_v22 = vld [vmem:[#allocation6 + $0x50] sm:$0xff]   ;;  %v963_v23 = vld [vmem:[#allocation6 + $0x58] sm:$0xff]   ;;  %s873_s20 = smul.u32 24, %s1438_s19 }
  0x8c   : > { %v964_v24 = vld [vmem:[#allocation6 + $0x60] sm:$0xff]   ;;  %v965_v25 = vld [vmem:[#allocation6 + $0x68] sm:$0xff]   ;;  %v966_v26 = vld [vmem:[#allocation6 + $0x70] sm:$0xff]  }
  0x8d   : > { %v945_v13 = vpack.i.bf16 %v460_v11, %v459_v10  ;;  %v967_v27 = vld [vmem:[#allocation6 + $0x78] sm:$0xff]   ;;  %v781_v28 = vld [vmem:[#allocation7] ss:$0 sm:$0xff]  ;;  %v792_v51 = vld [vmem:[#allocation7 + $0x1] ss:$0 sm:$0xff]  ;;  %s284_s6 = scalar_lea.vmem %s1419_s4, %s873_s20 }
  0x8e   : > { %824 = vmatpush3.bf16.msra.mxu0 %v951_v2 }
  0x8f   : > { %825 = vmatprep.subr.bf16.mxu0 %v1139_v0  ;;  %946 = vperm.xlu0 %944, %v945_v13  }
  0x92   : > { %826 = vmatpush3.bf16.msra.mxu0 %v952_v3 }
  0x93   : > { %827 = vmatprep.subr.bf16.mxu0 %v1139_v0 }
  0x96   : > { %828 = vmatpush3.bf16.msra.mxu0 %v953_v4 }
  0x97   : > { %829 = vmatprep.subr.bf16.mxu0 %v1139_v0 }
  0x9a   : > { %830 = vmatpush3.bf16.msra.mxu0 %v954_v5 }
  0x9b   : > { %831 = vmatprep.subr.bf16.mxu0 %v1139_v0 }
  0x9e   : > { %832 = vmatpush3.bf16.msra.mxu0 %v955_v6 }
  0x9f   : > { %833 = vmatprep.subr.bf16.mxu0 %v1139_v0 }
  0xa2   : > { %834 = vmatpush3.bf16.msra.mxu0 %v956_v7 }
  0xa3   : > { %835 = vmatprep.subr.bf16.mxu0 %v1139_v0 }
  0xa6   : > { %836 = vmatpush3.bf16.msra.mxu0 %v957_v8 }
  0xa7   : > { %867 = vmatprep.subr.bf16.mxu0 %v1139_v0 }
  0xa9   : > { %838 = vmatmul.mubr.bf16.vlgmr.msra.gmra.mrb[0].mxu0 %v288_v9 }
  0xaa   : > { %869 = vmatprep.mubr.msk.bf16.mxu0 %vm1140_vm0, %v1139_v0 }
 0x10e   : > { %v947_v30 = vpop.permute.xlu0 %946 }
 0x10f   : > { %v949_v35 = vunpack.i.h.bf16 %v947_v30  ;;  %v948_v36 = vunpack.i.l.bf16 %v947_v30 }
 0x17c   : > { %v394_v14 = vpop.f32.mrb[0].mxu0 }
 0x17d   : > { %v839_v15 = vpop.f32.mrb[1].mxu0 }
 0x17e   : > { %v397_v16 = vpop.f32.mrb[2].mxu0 }
 0x17f   : > { %v401_v18 = vpack.c.bf16 %v397_v16, %v394_v14  ;;  %v840_v19 = vpop.f32.mrb[3].mxu0 }
 0x181   : > { %842 = vmatpush3.bf16.msra.mxu1 %v401_v18 }
 0x182   : > { %847 = vmatprep.subr.bf16.mxu1 %v960_v17 }
 0x184   : > { %844 = vmatmul.mubr.msk.bf16.vlgmr.msra.gmra.mrb[0].mxu1 %vm412_vm1, %v1391_v20 }
 0x185   : > { %848 = vmatpush3.bf16.msra.mxu1 %v960_v17 }
 0x186   : > { %849 = vmatprep.subr.bf16.mxu1 %v961_v21 }
 0x189   : > { %850 = vmatpush3.bf16.msra.mxu1 %v961_v21 }
 0x18a   : > { %851 = vmatprep.subr.bf16.mxu1 %v962_v22 }
 0x18d   : > { %852 = vmatpush3.bf16.msra.mxu1 %v962_v22 }
 0x18e   : > { %853 = vmatprep.subr.bf16.mxu1 %v963_v23 }
 0x191   : > { %854 = vmatpush3.bf16.msra.mxu1 %v963_v23 }
 0x192   : > { %855 = vmatprep.subr.bf16.mxu1 %v964_v24 }
 0x195   : > { %856 = vmatpush3.bf16.msra.mxu1 %v964_v24 }
 0x196   : > { %857 = vmatprep.subr.bf16.mxu1 %v965_v25 }
 0x199   : > { %858 = vmatpush3.bf16.msra.mxu1 %v965_v25 }
 0x19a   : > { %859 = vmatprep.subr.bf16.mxu1 %v966_v26 }
 0x19d   : > { %860 = vmatpush3.bf16.msra.mxu1 %v966_v26 }
 0x19e   : > { %861 = vmatprep.subr.bf16.mxu1 %v967_v27 }
 0x1a1   : > { %862 = vmatpush3.bf16.msra.mxu1 %v967_v27 }
 0x257   : > { %v450_v29 = vpop.f32.mrb[0].mxu1 }
 0x258   : > { %v451_v31 = vadd.f32 %v781_v28, %v450_v29  ;;  %v845_v32 = vpop.f32.mrb[1].mxu1 }
 0x259   : > { %v453_v33 = vpop.f32.mrb[2].mxu1 }
 0x25a   : > { %v457_v34 = vmax.f32 %v451_v31, 0.0  ;;  %v454_v37 = vadd.f32 %v781_v28, %v453_v33  ;;  %v846_v38 = vpop.f32.mrb[3].mxu1 }
 0x25c   : > { %v458_v39 = vmax.f32 %v454_v37, 0.0  ;;  %v471_v40 = vmul.f32 %v948_v36, %v457_v34 }
 0x25e   : > { %v472_v41 = vmul.f32 %v949_v35, %v458_v39 }
 0x260   : > { %v473_v42 = vmax.f32 %v471_v40, %v472_v41  ;;  %v480_v43 = vpack.c.bf16 %v472_v41, %v471_v40 }
 0x262   : > { %v474_v44 = vrot.slane %v473_v42, 4  ;;  %863 = vmatprep.mubr.bf16.mxu1 %v480_v43 }
 0x264   : > { %v475_v45 = vmax.f32 %v473_v42, %v474_v44 }
 0x266   : > { %v476_v46 = vrot.slane %v475_v45, 2 }
 0x268   : > { %v477_v47 = vmax.f32 %v475_v45, %v476_v46 }
 0x26a   : > { %v478_v48 = vrot.slane %v477_v47, 1 }
 0x26c   : > { %v479_v49 = vmax.f32 %v477_v47, %v478_v48 }
 0x26e   : > { %v481_v50 = vpack.c.bf16 %v479_v49, %v479_v49 }
 0x270   : > { %864 = vmatmul.mubr.bf16.vlgmr.msra.gmra.mrb[4].mxu1 %v481_v50 }
 0x343   : > { %v865_v52 = vpop.f32.mrb[4].mxu1 }
 0x344   : > { %v642_v53 = vadd.f32 %v865_v52, %v792_v51  ;;  %v581_v54 = vpop.f32.mrb[5].mxu1 }
 0x345   : > { %v866_v55 = vpop.f32.mrb[6].mxu1 }
 0x346   : > { %645 = vst [vmem:[%s284_s6 + $0x10] sm:$0xff] %v642_v53  ;;  %v584_v56 = vpop.f32.mrb[7].mxu1 }
 0x347   : > { %v595_v57 = vpack.c.bf16 %v584_v56, %v581_v54 }
 0x349   : > { %868 = vmatpush3.bf16.msra.mxu0 %v595_v57 }
 0x34c   : > { %870 = vmatmul.mubr.msk.bf16.vlgmr.msra.gmra.mrb[4].mxu0 %vm412_vm1, %v1391_v20 }
 0x41f   : > { %v635_v58 = vpop.f32.mrb[4].mxu0 }
 0x420   : > { %v636_v59 = vadd.f32 %v792_v51, %v635_v58  ;;  %v871_v60 = vpop.f32.mrb[5].mxu0 }
 0x421   : > { %v638_v61 = vpop.f32.mrb[6].mxu0 }
 0x422   : > { %643 = vst [vmem:[%s284_s6] sm:$0xff] %v636_v59  ;;  %v639_v62 = vadd.f32 %v792_v51, %v638_v61  ;;  %v872_v63 = vpop.f32.mrb[7].mxu0 }
 0x424   : > { %644 = vst [vmem:[%s284_s6 + $0x8] sm:$0xff] %v639_v62 }
 0x425 PF: > { %p18_p12 = scmp.ge.s32.totalorder %s1263_s5, 6   ;;  %s1433_s15 = smov %s1123_s16 }
 0x426   : > { %s1434_s16 = smov %s1127_s17  ;;  %s1435_s17 = smov %s1274_s8 }
 0x427   : > { %s1436_s18 = smov %s1263_s5  ;;  %20 = sbr.rel (!%p18_p12) target bundleno = 6 (0x6), region = 98 }
 0x42e   :  { %667 = vsyncpa [#allocation3], 1 }
 0x42f   :  { %669 = vsyncpa [#allocation3 + $0x1], 1 }
 0x430   :  { %670 = vsyncpa [#allocation5], 1 }
 0x431   :  { %672 = vsyncpa [#allocation5 + $0x1], 1 }
 0x432   :  { %673 = vsyncpa [#allocation8], 1 }

</bundles_post_ra>
